<compile_context>
chip_gen: v5e
topology: v5e:2x2
jax: 0.10.0
libtpu: 0.0.40
codegen_flags: <defaults>
</compile_context>

<pallas_src>
import jax
import jax.numpy as jnp
from jax.experimental import pallas as pl
from jax.experimental.pallas import tpu as pltpu


def _round_up(x, m):
    return ((x + m - 1) // m) * m


def _cdiv(a, b):
    return (a + b - 1) // b


OUT_LANE_PAD = 128  # lane-dense output width (>= action_dim, multiple of 128)


# ---------------------------------------------------------------------------
# Kernel
# ---------------------------------------------------------------------------
def dueling_dqn_kernel(x_ref,
                       w1_ref, b1_ref,
                       w2_ref, b2_ref,
                       wbr_ref, bbr_ref,   # fused value|adv hidden [256, 256]
                       wq_ref, bq_ref,     # folded dueling head    [256, OUT]
                       out_ref):
    # f1 + relu  (bf16 weights & activations, f32 accumulate, f32 bias/relu)
    x = x_ref[...].astype(jnp.bfloat16)
    h1 = jnp.dot(x, w1_ref[...], preferred_element_type=jnp.float32) + b1_ref[...]
    h1 = jnp.maximum(h1, 0.0)

    # f2 + relu
    h2 = jnp.dot(h1.astype(jnp.bfloat16), w2_ref[...],
                 preferred_element_type=jnp.float32) + b2_ref[...]
    h2 = jnp.maximum(h2, 0.0)

    # fused value|advantage hidden layer + relu  -> [TB, 256] = [vh | ah]
    br = jnp.dot(h2.astype(jnp.bfloat16), wbr_ref[...],
                 preferred_element_type=jnp.float32) + bbr_ref[...]
    br = jnp.maximum(br, 0.0)

    # folded dueling head: one matmul produces Q directly (mean/val broadcast
    # are already baked into wq/bq).  Output is 128-lane padded -> plain vst.
    out_ref[...] = jnp.dot(br.astype(jnp.bfloat16), wq_ref[...],
                           preferred_element_type=jnp.float32) + bq_ref[...]


# ---------------------------------------------------------------------------
# Parameter preparation (fusion + dueling fold + bf16 cast) — done once.
# ---------------------------------------------------------------------------
def prepare_params(params):
    """Fuse branch weights, fold dueling combine into head weights (in f32),
    lane-pad the head to OUT_LANE_PAD, cast weights to bf16, biases stay f32."""
    action_dim = params["wa"].shape[1]
    out_pad = max(OUT_LANE_PAD, _round_up(action_dim, 128))

    # fused branch: [256, 128+128] = [256, 256]   (columns: [value | adv])
    w_branch = jnp.concatenate([params["wvh"], params["wah"]], axis=1)
    b_branch = jnp.concatenate([params["bvh"], params["bah"]], axis=1)

    # Folded dueling head (exact, done in f32 before the bf16 cast):
    #   Q = adv + val - mean(adv)
    #     = vh @ tile(Wv, (1,A)) + ah @ (Wa - colmean(Wa)) + (bv + ba - mean(ba))
    wv_rep = jnp.tile(params["wv"], (1, action_dim))                    # [128, A]
    wa_ctr = params["wa"] - jnp.mean(params["wa"], axis=1, keepdims=True)
    w_q = jnp.concatenate([wv_rep, wa_ctr], axis=0)                     # [256, A]
    b_q = params["bv"] + params["ba"] - jnp.mean(params["ba"], axis=1,
                                                 keepdims=True)         # [1, A]

    # Lane-dense padding of the head to a multiple of 128 output lanes.
    w_q = jnp.pad(w_q, ((0, 0), (0, out_pad - action_dim)))
    b_q = jnp.pad(b_q, ((0, 0), (0, out_pad - action_dim)))

    return {
        "w1": params["w1"].astype(jnp.bfloat16), "b1": params["b1"],
        "w2": params["w2"].astype(jnp.bfloat16), "b2": params["b2"],
        "w_branch": w_branch.astype(jnp.bfloat16), "b_branch": b_branch,
        "w_q": w_q.astype(jnp.bfloat16), "b_q": b_q,
        "action_dim": action_dim, "out_pad": out_pad,
    }


# ---------------------------------------------------------------------------
# Chip-aware batch tiling
# ---------------------------------------------------------------------------
def _tpu_kind():
    try:
        return (jax.devices()[0].device_kind or "").lower()
    except Exception:
        return ""


def _choose_batch_tiling(B, *, tb_max=None, num_tc=None):
    kind = _tpu_kind()
    if tb_max is None:
        # v5e: smaller M tile (1 vst slot, 4x128 MXU). v6e/v7x: bigger tile
        # to amortize the ~0.35us per-grid-step overhead.
        tb_max = 256 if ("v5" in kind) else 512
    if num_tc is None:
        num_tc = 2 if ("v7" in kind) else 1   # v7x: 2 TensorCores per chip

    # Force >=2 balanced tiles on multi-TC chips once B is large enough to care.
    min_tiles = num_tc if (num_tc > 1 and B >= 128 * num_tc) else 1
    n_tiles = max(_cdiv(B, tb_max), min_tiles)
    # Balanced tiles (avoids a nearly-all-padding tail tile), sublane aligned.
    TB = _round_up(_cdiv(B, n_tiles), 8)
    B_pad = TB * n_tiles
    return TB, B_pad, n_tiles


# ---------------------------------------------------------------------------
# Wrapper
# ---------------------------------------------------------------------------
def dueling_dqn_forward(x, fused, *, batch_tile=None):
    """x: [B, state_dim] f32.  fused: dict from prepare_params().  -> [B, A]"""
    B, state_dim = x.shape
    action_dim = fused["action_dim"]
    out_pad = fused["out_pad"]

    if batch_tile is not None:
        TB = _round_up(batch_tile, 8)
        B_pad = _round_up(B, TB)
        n_tiles = B_pad // TB
    else:
        TB, B_pad, n_tiles = _choose_batch_tiling(B)

    if B_pad != B:
        x = jnp.pad(x, ((0, B_pad - B), (0, 0)))
    grid = (n_tiles,)

    weights = (
        fused["w1"], fused["b1"],
        fused["w2"], fused["b2"],
        fused["w_branch"], fused["b_branch"],
        fused["w_q"], fused["b_q"],
    )

    # Weights/biases: whole-array blocks, constant index_map -> DMA'd once and
    # VMEM-resident across all batch-grid steps.
    weight_specs = [pl.BlockSpec(w.shape, lambda i: (0, 0)) for w in weights]
    in_specs = [pl.BlockSpec((TB, state_dim), lambda i: (i, 0))] + weight_specs
    out_specs = pl.BlockSpec((TB, out_pad), lambda i: (i, 0))

    # Advisory cost estimate for XLA's scheduler around this small custom call.
    flops = 2 * B_pad * (state_dim * 512 + 512 * 256 + 256 * 256
                         + 256 * out_pad)
    param_bytes = sum(int(w.size) * w.dtype.itemsize for w in weights)
    bytes_accessed = (param_bytes
                      + B_pad * state_dim * 4
                      + B_pad * out_pad * 4)

    out = pl.pallas_call(
        dueling_dqn_kernel,
        out_shape=jax.ShapeDtypeStruct((B_pad, out_pad), jnp.float32),
        grid=grid,
        in_specs=in_specs,
        out_specs=out_specs,
        compiler_params=pltpu.CompilerParams(
            dimension_semantics=("parallel",),
            vmem_limit_bytes=32 * 1024 * 1024),
        cost_estimate=pl.CostEstimate(
            flops=flops, transcendentals=0, bytes_accessed=bytes_accessed),
    )(x, *weights)

    # TODO(synk): for per-step actor workloads (B ~ 1-8 called repeatedly),
    # keep the ~0.45 MB of bf16 weights resident across calls via a separate
    # prefetch pallas_call returning (DMA semaphore, VMEM ref) futures instead
    # of re-DMA-ing them every invocation; or batch actor states.
    return out[:B, :action_dim]


# ---------------------------------------------------------------------------
# Init + references
# ---------------------------------------------------------------------------
def init_params(key, state_dim, action_dim):
    """PyTorch-Linear-style init. Weights stored [in, out], biases [1, out]."""
    dims = [
        ("w1", "b1", state_dim, 512),
        ("w2", "b2", 512, 256),
        ("wvh", "bvh", 256, 128),
        ("wah", "bah", 256, 128),
        ("wv", "bv", 128, 1),
        ("wa", "ba", 128, action_dim),
    ]
    params = {}
    for wname, bname, fan_in, fan_out in dims:
        key, kw, kb = jax.random.split(key, 3)
        bound = 1.0 / jnp.sqrt(jnp.float32(fan_in))
        params[wname] = jax.random.uniform(
            kw, (fan_in, fan_out), jnp.float32, minval=-bound, maxval=bound)
        params[bname] = jax.random.uniform(
            kb, (1, fan_out), jnp.float32, minval=-bound, maxval=bound)
    return params


def reference_forward_fused(x, fused):
    """Pure-JAX reference matching the kernel's fused / bf16 math exactly."""
    def mm(a, w):
        return jnp.dot(a.astype(jnp.bfloat16), w,
                       preferred_element_type=jnp.float32)
    h1 = jnp.maximum(mm(x, fused["w1"]) + fused["b1"], 0.0)
    h2 = jnp.maximum(mm(h1, fused["w2"]) + fused["b2"], 0.0)
    br = jnp.maximum(mm(h2, fused["w_branch"]) + fused["b_branch"], 0.0)
    q = mm(br, fused["w_q"]) + fused["b_q"]
    return q[:, :fused["action_dim"]]


def reference_forward_f32(x, p):
    """Full-precision reference of the original PyTorch forward."""
    h1 = jnp.maximum(x @ p["w1"] + p["b1"], 0.0)
    h2 = jnp.maximum(h1 @ p["w2"] + p["b2"], 0.0)
    vh = jnp.maximum(h2 @ p["wvh"] + p["bvh"], 0.0)
    ah = jnp.maximum(h2 @ p["wah"] + p["bah"], 0.0)
    val = vh @ p["wv"] + p["bv"]
    adv = ah @ p["wa"] + p["ba"]
    return adv + val - jnp.mean(adv, axis=1, keepdims=True)


if __name__ == "__main__":
    STATE_DIM, ACTION_DIM = 16, 4

    key = jax.random.PRNGKey(0)
    key, kx1, kx2 = jax.random.split(key, 3)
    params = init_params(key, STATE_DIM, ACTION_DIM)
    fused = prepare_params(params)

    # --- small batch (actor-style) ---
    B1 = 8
    x1 = jax.random.normal(kx1, (B1, STATE_DIM), jnp.float32)
    q1 = jax.block_until_ready(dueling_dqn_forward(x1, fused))
    assert q1.shape == (B1, ACTION_DIM)
    q1_ref = reference_forward_fused(x1, fused)
    assert jnp.allclose(q1, q1_ref, atol=2e-3, rtol=2e-3), "mismatch vs fused ref (B=8)"
    q1_f32 = reference_forward_f32(x1, params)
    assert jnp.allclose(q1, q1_f32, atol=5e-2, rtol=5e-2), "mismatch vs f32 ref (B=8)"

    # --- larger, non-aligned batch (exercises balanced multi-tile + padding) ---
    B2 = 300
    x2 = jax.random.normal(kx2, (B2, STATE_DIM), jnp.float32)
    q2 = jax.block_until_ready(dueling_dqn_forward(x2, fused))
    assert q2.shape == (B2, ACTION_DIM)
    q2_ref = reference_forward_fused(x2, fused)
    assert jnp.allclose(q2, q2_ref, atol=2e-3, rtol=2e-3), "mismatch vs fused ref (B=300)"
    q2_f32 = reference_forward_f32(x2, params)
    assert jnp.allclose(q2, q2_f32, atol=5e-2, rtol=5e-2), "mismatch vs f32 ref (B=300)"

    print("KERNEL_OK")
</pallas_src>

<mosaic_0001>
module attributes {stable_mosaic.version = 11 : i64} {
  func.func @dueling_dqn_kernel(%arg0: i32, %arg1: memref<8x16xf32, #tpu.memory_space<vmem>>, %arg2: memref<16x512xbf16, #tpu.memory_space<vmem>>, %arg3: memref<1x512xf32, #tpu.memory_space<vmem>>, %arg4: memref<512x256xbf16, #tpu.memory_space<vmem>>, %arg5: memref<1x256xf32, #tpu.memory_space<vmem>>, %arg6: memref<256x256xbf16, #tpu.memory_space<vmem>>, %arg7: memref<1x256xf32, #tpu.memory_space<vmem>>, %arg8: memref<256x128xbf16, #tpu.memory_space<vmem>>, %arg9: memref<1x128xf32, #tpu.memory_space<vmem>>, %arg10: memref<8x128xf32, #tpu.memory_space<vmem>>) attributes {dimension_semantics = [#tpu.dimension_semantics<parallel>], iteration_bounds = array<i64: 1>, scalar_prefetch = 0 : i64, scratch_operands = 0 : i64, tpu.core_type = #tpu.core_type<tc>, window_params = [{transform_indices = @transform_0, window_bounds = array<i64: 8, 16>}, {pipeline_mode = #tpu.pipeline_mode<synchronous>, transform_indices = @transform_1, window_bounds = array<i64: 16, 512>}, {pipeline_mode = #tpu.pipeline_mode<synchronous>, transform_indices = @transform_2, window_bounds = array<i64: 1, 512>}, {pipeline_mode = #tpu.pipeline_mode<synchronous>, transform_indices = @transform_3, window_bounds = array<i64: 512, 256>}, {pipeline_mode = #tpu.pipeline_mode<synchronous>, transform_indices = @transform_4, window_bounds = array<i64: 1, 256>}, {pipeline_mode = #tpu.pipeline_mode<synchronous>, transform_indices = @transform_5, window_bounds = array<i64: 256, 256>}, {pipeline_mode = #tpu.pipeline_mode<synchronous>, transform_indices = @transform_6, window_bounds = array<i64: 1, 256>}, {pipeline_mode = #tpu.pipeline_mode<synchronous>, transform_indices = @transform_7, window_bounds = array<i64: 256, 128>}, {pipeline_mode = #tpu.pipeline_mode<synchronous>, transform_indices = @transform_8, window_bounds = array<i64: 1, 128>}, {transform_indices = @transform_9, window_bounds = array<i64: 8, 128>}]} {
    %c0 = arith.constant 0 : index
    %c0_0 = arith.constant 0 : index
    %0 = vector.load %arg1[%c0, %c0_0] : memref<8x16xf32, #tpu.memory_space<vmem>>, vector<8x16xf32>
    %1 = arith.truncf %0 : vector<8x16xf32> to vector<8x16xbf16>
    %c0_1 = arith.constant 0 : index
    %c0_2 = arith.constant 0 : index
    %2 = vector.load %arg2[%c0_1, %c0_2] : memref<16x512xbf16, #tpu.memory_space<vmem>>, vector<16x512xbf16>
    %cst = arith.constant dense<0.000000e+00> : vector<8x512xf32>
    %3 = tpu.matmul %1, %2, %cst {dimension_numbers = #tpu.dot_dimension_numbers<[1], [0], [0], [1], [0, 0, 1, 1], [], []>} : vector<8x16xbf16>, vector<16x512xbf16>, vector<8x512xf32> -> vector<8x512xf32>
    %c0_3 = arith.constant 0 : index
    %c0_4 = arith.constant 0 : index
    %4 = vector.load %arg3[%c0_3, %c0_4] : memref<1x512xf32, #tpu.memory_space<vmem>>, vector<1x512xf32>
    %5 = vector.broadcast %4 : vector<1x512xf32> to vector<8x512xf32>
    %6 = arith.addf %3, %5 : vector<8x512xf32>
    %cst_5 = arith.constant 0.000000e+00 : f32
    %7 = vector.broadcast %cst_5 : f32 to vector<8x512xf32>
    %8 = arith.maximumf %6, %7 : vector<8x512xf32>
    %9 = arith.truncf %8 : vector<8x512xf32> to vector<8x512xbf16>
    %c0_6 = arith.constant 0 : index
    %c0_7 = arith.constant 0 : index
    %10 = vector.load %arg4[%c0_6, %c0_7] : memref<512x256xbf16, #tpu.memory_space<vmem>>, vector<512x256xbf16>
    %cst_8 = arith.constant dense<0.000000e+00> : vector<8x256xf32>
    %11 = tpu.matmul %9, %10, %cst_8 {dimension_numbers = #tpu.dot_dimension_numbers<[1], [0], [0], [1], [0, 0, 1, 1], [], []>} : vector<8x512xbf16>, vector<512x256xbf16>, vector<8x256xf32> -> vector<8x256xf32>
    %c0_9 = arith.constant 0 : index
    %c0_10 = arith.constant 0 : index
    %12 = vector.load %arg5[%c0_9, %c0_10] : memref<1x256xf32, #tpu.memory_space<vmem>>, vector<1x256xf32>
    %13 = vector.broadcast %12 : vector<1x256xf32> to vector<8x256xf32>
    %14 = arith.addf %11, %13 : vector<8x256xf32>
    %cst_11 = arith.constant 0.000000e+00 : f32
    %15 = vector.broadcast %cst_11 : f32 to vector<8x256xf32>
    %16 = arith.maximumf %14, %15 : vector<8x256xf32>
    %17 = arith.truncf %16 : vector<8x256xf32> to vector<8x256xbf16>
    %c0_12 = arith.constant 0 : index
    %c0_13 = arith.constant 0 : index
    %18 = vector.load %arg6[%c0_12, %c0_13] : memref<256x256xbf16, #tpu.memory_space<vmem>>, vector<256x256xbf16>
    %cst_14 = arith.constant dense<0.000000e+00> : vector<8x256xf32>
    %19 = tpu.matmul %17, %18, %cst_14 {dimension_numbers = #tpu.dot_dimension_numbers<[1], [0], [0], [1], [0, 0, 1, 1], [], []>} : vector<8x256xbf16>, vector<256x256xbf16>, vector<8x256xf32> -> vector<8x256xf32>
    %c0_15 = arith.constant 0 : index
    %c0_16 = arith.constant 0 : index
    %20 = vector.load %arg7[%c0_15, %c0_16] : memref<1x256xf32, #tpu.memory_space<vmem>>, vector<1x256xf32>
    %21 = vector.broadcast %20 : vector<1x256xf32> to vector<8x256xf32>
    %22 = arith.addf %19, %21 : vector<8x256xf32>
    %cst_17 = arith.constant 0.000000e+00 : f32
    %23 = vector.broadcast %cst_17 : f32 to vector<8x256xf32>
    %24 = arith.maximumf %22, %23 : vector<8x256xf32>
    %25 = arith.truncf %24 : vector<8x256xf32> to vector<8x256xbf16>
    %c0_18 = arith.constant 0 : index
    %c0_19 = arith.constant 0 : index
    %26 = vector.load %arg8[%c0_18, %c0_19] : memref<256x128xbf16, #tpu.memory_space<vmem>>, vector<256x128xbf16>
    %cst_20 = arith.constant dense<0.000000e+00> : vector<8x128xf32>
    %27 = tpu.matmul %25, %26, %cst_20 {dimension_numbers = #tpu.dot_dimension_numbers<[1], [0], [0], [1], [0, 0, 1, 1], [], []>} : vector<8x256xbf16>, vector<256x128xbf16>, vector<8x128xf32> -> vector<8x128xf32>
    %c0_21 = arith.constant 0 : index
    %c0_22 = arith.constant 0 : index
    %28 = vector.load %arg9[%c0_21, %c0_22] : memref<1x128xf32, #tpu.memory_space<vmem>>, vector<1x128xf32>
    %29 = vector.broadcast %28 : vector<1x128xf32> to vector<8x128xf32>
    %30 = arith.addf %27, %29 : vector<8x128xf32>
    %c0_23 = arith.constant 0 : index
    %c0_24 = arith.constant 0 : index
    %31 = vector.load %arg10[%c0_23, %c0_24] : memref<8x128xf32, #tpu.memory_space<vmem>>, vector<8x128xf32>
    tpu.vector_store %arg10[%c0_23, %c0_24], %30 {strides = array<i32>} : memref<8x128xf32, #tpu.memory_space<vmem>>, vector<8x128xf32>,
    return
  }
  func.func @transform_0(%arg0: i32) -> (i32, i32) {
    %c0_i32 = arith.constant 0 : i32
    %c0_i32_0 = arith.constant 0 : i32
    return %arg0, %c0_i32 : i32, i32
  }
  func.func @transform_1(%arg0: i32) -> (i32, i32) {
    %c0_i32 = arith.constant 0 : i32
    %c0_i32_0 = arith.constant 0 : i32
    %c0_i32_1 = arith.constant 0 : i32
    return %c0_i32, %c0_i32_0 : i32, i32
  }
  func.func @transform_2(%arg0: i32) -> (i32, i32) {
    %c0_i32 = arith.constant 0 : i32
    %c0_i32_0 = arith.constant 0 : i32
    %c0_i32_1 = arith.constant 0 : i32
    return %c0_i32, %c0_i32_0 : i32, i32
  }
  func.func @transform_3(%arg0: i32) -> (i32, i32) {
    %c0_i32 = arith.constant 0 : i32
    %c0_i32_0 = arith.constant 0 : i32
    %c0_i32_1 = arith.constant 0 : i32
    return %c0_i32, %c0_i32_0 : i32, i32
  }
  func.func @transform_4(%arg0: i32) -> (i32, i32) {
    %c0_i32 = arith.constant 0 : i32
    %c0_i32_0 = arith.constant 0 : i32
    %c0_i32_1 = arith.constant 0 : i32
    return %c0_i32, %c0_i32_0 : i32, i32
  }
  func.func @transform_5(%arg0: i32) -> (i32, i32) {
    %c0_i32 = arith.constant 0 : i32
    %c0_i32_0 = arith.constant 0 : i32
    %c0_i32_1 = arith.constant 0 : i32
    return %c0_i32, %c0_i32_0 : i32, i32
  }
  func.func @transform_6(%arg0: i32) -> (i32, i32) {
    %c0_i32 = arith.constant 0 : i32
    %c0_i32_0 = arith.constant 0 : i32
    %c0_i32_1 = arith.constant 0 : i32
    return %c0_i32, %c0_i32_0 : i32, i32
  }
  func.func @transform_7(%arg0: i32) -> (i32, i32) {
    %c0_i32 = arith.constant 0 : i32
    %c0_i32_0 = arith.constant 0 : i32
    %c0_i32_1 = arith.constant 0 : i32
    return %c0_i32, %c0_i32_0 : i32, i32
  }
  func.func @transform_8(%arg0: i32) -> (i32, i32) {
    %c0_i32 = arith.constant 0 : i32
    %c0_i32_0 = arith.constant 0 : i32
    %c0_i32_1 = arith.constant 0 : i32
    return %c0_i32, %c0_i32_0 : i32, i32
  }
  func.func @transform_9(%arg0: i32) -> (i32, i32) {
    %c0_i32 = arith.constant 0 : i32
    %c0_i32_0 = arith.constant 0 : i32
    return %arg0, %c0_i32 : i32, i32
  }
}

</mosaic_0001>

<bundles_post_ra>
// kernel: tpu_custom_call.1
= control target key start
LH: loop header
LB: loop body
LE: loop exit
PB: predicated region body
PF: predicated region fallthrough
CT: control target
= control target key end

     0   :  { %14 = vsyncpa [#allocation3], 0  ;;  %s2034_s0 = inlined_call_operand.hbm [shape: f32[8,16], index: 0, kind: input, shape index: {}]   ;;  %s2035_s1 = inlined_call_operand.hbm [shape: bf16[16,512], index: 1, kind: input, shape index: {}]   ;;  %s2036_s2 = inlined_call_operand.hbm [shape: f32[1,512], index: 2, kind: input, shape index: {}]   ;;  %s2037_s3 = inlined_call_operand.hbm [shape: bf16[512,256], index: 3, kind: input, shape index: {}]   ;;  %s2038_s4 = inlined_call_operand.vmem [shape: f32[1,256], index: 4, kind: input, shape index: {}]   ;;  %s2039_s5 = inlined_call_operand.hbm [shape: bf16[256,256], index: 5, kind: input, shape index: {}]   ;;  %s2040_s6 = inlined_call_operand.vmem [shape: f32[1,256], index: 6, kind: input, shape index: {}]   ;;  %s2041_s7 = inlined_call_operand.hbm [shape: bf16[256,128], index: 7, kind: input, shape index: {}]   ;;  %s2042_s8 = inlined_call_operand.vmem [shape: f32[1,128], index: 8, kind: input, shape index: {}]   ;;  %s2043_s9 = inlined_call_operand.hbm [shape: f32[8,128], index: 9, kind: output, shape index: {}]  }
   0x1   :  { %15 = vsyncpa [#allocation6], 0 }
   0x2   :  { %16 = vsyncpa [#allocation9], 0 }
   0x3   :  { %17 = vsyncpa [#allocation12], 0  ;;  %s34_s11 = sshll.u32 %s2035_s1, 4  ;;  %s35_s11 = int_to_ptr.hbm [resolvable:$true] %s34_s11 }
   0x4   :  { %18 = vsyncpa [#allocation4], 0  ;;  %s1931_s12 = smov [#allocation5]   ;;  %s58_s16 = sshll.u32 %s2037_s3, 4  ;;  %s59_s16 = int_to_ptr.hbm [resolvable:$true] %s58_s16 }
   0x5   :  { %s36_s13 = sshll.u32 %s1931_s12, 4  ;;  %s1932_s17 = smov 256   ;;  %s37_s13 = int_to_ptr.vmem [resolvable:$true] %s36_s13 }
   0x6   :  { %s1933_s18 = smov 16   ;;  %s1934_s19 = smov [#allocation8]  }
   0x7   :  { %42 = dma.hbm_to_vmem [thread:$0]  %s35_s11, 512, %s37_s13, [#allocation6], %s1932_s17, %s1932_s17, %s1933_s18  }
   0x8   :  { %s60_s20 = sshll.u32 %s1934_s19, 4  ;;  %s1935_s21 = smov 128   ;;  %s61_s20 = int_to_ptr.vmem [resolvable:$true] %s60_s20 }
   0x9   :  { %s1936_s22 = smov 8   ;;  %s24_s24 = sshll.u32 %s2034_s0, 4  ;;  %s25_s24 = int_to_ptr.hbm [resolvable:$true] %s24_s24 }
   0xa   :  { %66 = dma.hbm_to_vmem [thread:$0]  %s59_s16, 8192, %s61_s20, [#allocation9], %s1935_s21, %s1935_s21, %s1936_s22  }
   0xb   :  { %s1937_s25 = smov [#allocation2]   ;;  %s48_s28 = sshll.u32 %s2036_s2, 4  ;;  %s49_s28 = int_to_ptr.hbm [resolvable:$true] %s48_s28 }
   0xc   :  { %s26_s26 = sshll.u32 %s1937_s25, 4  ;;  %s1938_s29 = smov [#allocation7]   ;;  %s27_s26 = int_to_ptr.vmem [resolvable:$true] %s26_s26 }
   0xd   :  { %29 = dma.hbm_to_vmem [thread:$0]  %s25_s24, 128, %s27_s26, [#allocation3]  }
   0xe   :  { %s50_s30 = sshll.u32 %s1938_s29, 4  ;;  %s73_s12 = sshll.u32 %s2039_s5, 4  ;;  %s51_s30 = int_to_ptr.vmem [resolvable:$true] %s50_s30  ;;  %s74_s12 = int_to_ptr.hbm [resolvable:$true] %s73_s12 }
   0xf   :  { %53 = dma.hbm_to_vmem [thread:$0]  %s49_s28, 64, %s51_s30, [#allocation6]  }
  0x10   :  { %s88_s14 = sshll.u32 %s2041_s7, 4  ;;  %s1939_s15 = smov [#allocation10]   ;;  %s89_s14 = int_to_ptr.hbm [resolvable:$true] %s88_s14 }
  0x11   :  { %s75_s16 = sshll.u32 %s1939_s15, 4  ;;  %s1940_s2 = smov [#allocation11]   ;;  %s76_s16 = int_to_ptr.vmem [resolvable:$true] %s75_s16 }
  0x12   :  { %81 = dma.hbm_to_vmem [thread:$0]  %s74_s12, 4096, %s76_s16, [#allocation9], %s1935_s21, %s1935_s21, %s1936_s22  }
  0x13   :  { %s90_s17 = sshll.u32 %s1940_s2, 4  ;;  %s1941_s18 = smov 64   ;;  %s91_s17 = int_to_ptr.vmem [resolvable:$true] %s90_s17 }
  0x14   :  { %s1942_s19 = smov 4  }
  0x15   :  { %96 = dma.hbm_to_vmem [thread:$0]  %s89_s14, 2048, %s91_s17, [#allocation12], %s1941_s18, %s1941_s18, %s1942_s19  }
  0x16   :  { %1921 = dma.done.wait [#allocation3], 128  }
  0x17   :  { %1922 = vsyncadd [#allocation3], 4294967168 }
  0x18   :  { %1923 = dma.done.wait [#allocation6], 576  }
  0x19   :  { %1924 = vsyncadd [#allocation6], 4294966720 }
  0x1a   :  { %1925 = dma.done.wait [#allocation9], 12288  }
  0x1b   :  { %1926 = vsyncadd [#allocation9], 4294955008 }
  0x1c   :  { %1927 = dma.done.wait [#allocation12], 2048  }
  0x1d   :  { %1928 = vsyncadd [#allocation12], 4294965248  ;;  %v1157_v0 = vld [vmem:[#allocation5] sm:$0xf]  ;;  %v1625_v1 = vld [vmem:[#allocation5 + $0xc] sm:$0xf0] }
  0x1e   :  { %v1623_v2 = vld [vmem:[#allocation5 + $0x4] sm:$0xf]  ;;  %v1158_v3 = vor.u32 %v1625_v1, %v1157_v0  ;;  %v1159_v4 = vld [vmem:[#allocation5 + $0x10] sm:$0xf0]  ;;  %v124_v5 = vld [vmem:[#allocation2] sm:$0xff]  ;;  %vm160_vm0 = vcmask 130048  }
  0x1f   :  { %v1165_v6 = vld [vmem:[#allocation5 + $0x8] sm:$0xf]  ;;  %v1162_v7 = vor.u32 %v1623_v2, %v1159_v4  ;;  %v2012_v8 = vpack.c.bf16 %v124_v5, %v124_v5  ;;  %v1626_v9 = vld [vmem:[#allocation5 + $0x14] sm:$0xf0]  ;;  %v1624_v10 = vld [vmem:[#allocation5 + $0xc] sm:$0xf] }
  0x20   :  { %v1167_v11 = vld [vmem:[#allocation5 + $0x18] sm:$0xf0]  ;;  %171 = vmatpush.bf16.msra.mxu2 %v1158_v3  ;;  %v1166_v12 = vor.u32 %v1626_v9, %v1165_v6  ;;  %v1233_v14 = vld [vmem:[#allocation8 + $0x70] sm:$0xf]  ;;  %v1225_v19 = vld [vmem:[#allocation8 + $0x60] sm:$0xf] }
  0x21   :  { %v1170_v13 = vor.u32 %v1624_v10, %v1167_v11  ;;  %v1642_v15 = vld [vmem:[#allocation8 + $0x74] sm:$0xf0]  ;;  %v1297_v16 = vld [vmem:[#allocation8 + $0xf0] sm:$0xf]  ;;  %184 = vmatpush.bf16.msra.mxu3 %v1162_v7  ;;  %v1640_v20 = vld [vmem:[#allocation8 + $0x64] sm:$0xf0] }
  0x22   :  { %v1234_v17 = vor.u32 %v1642_v15, %v1233_v14  ;;  %v1658_v18 = vld [vmem:[#allocation8 + $0xf4] sm:$0xf0]  ;;  %v1289_v22 = vld [vmem:[#allocation8 + $0xe0] sm:$0xf]  ;;  %v1656_v23 = vld [vmem:[#allocation8 + $0xe4] sm:$0xf0]  ;;  %v1226_v24 = vor.u32 %v1640_v20, %v1225_v19 }
  0x23   :  { %v1298_v21 = vor.u32 %v1658_v18, %v1297_v16  ;;  %1171 = vmatmul.msk.bf16.vlgmr.msra.gmra.mxu2 %vm160_vm0, %v2012_v8  ;;  %v1290_v25 = vor.u32 %v1656_v23, %v1289_v22  ;;  %v1217_v26 = vld [vmem:[#allocation8 + $0x50] sm:$0xf]  ;;  %v1638_v27 = vld [vmem:[#allocation8 + $0x54] sm:$0xf0]  ;;  %v1209_v36 = vld [vmem:[#allocation8 + $0x40] sm:$0xf] }
  0x24   :  { %197 = vmatpush.bf16.msrb.mxu2 %v1166_v12  ;;  %614 = vmatpush.bf16.msra.mxu0 %v1234_v17  ;;  %v1281_v28 = vld [vmem:[#allocation8 + $0xd0] sm:$0xf]  ;;  %v1654_v29 = vld [vmem:[#allocation8 + $0xd4] sm:$0xf0]  ;;  %v1218_v31 = vor.u32 %v1638_v27, %v1217_v26  ;;  %v1636_v37 = vld [vmem:[#allocation8 + $0x44] sm:$0xf0] }
  0x25   :  { %210 = vmatpush.bf16.msrb.mxu3 %v1170_v13  ;;  %627 = vmatpush.bf16.msra.mxu1 %v1298_v21  ;;  %v1361_v30 = vld [vmem:[#allocation8 + $0x170] sm:$0xf]  ;;  %v1674_v32 = vld [vmem:[#allocation8 + $0x174] sm:$0xf0]  ;;  %v1282_v35 = vor.u32 %v1654_v29, %v1281_v28  ;;  %v1273_v38 = vld [vmem:[#allocation8 + $0xc0] sm:$0xf]  ;;  %v1210_v47 = vor.u32 %v1636_v37, %v1209_v36 }
  0x26   :  { %1172 = vmatmul.msk.bf16.vlgmr.msra.gmra.mxu3 %vm160_vm0, %v2012_v8  ;;  %v1425_v33 = vld [vmem:[#allocation8 + $0x1f0] sm:$0xf]  ;;  %v1690_v34 = vld [vmem:[#allocation8 + $0x1f4] sm:$0xf0]  ;;  %v1362_v39 = vor.u32 %v1674_v32, %v1361_v30  ;;  %v1652_v41 = vld [vmem:[#allocation8 + $0xc4] sm:$0xf0] }
  0x27   :  { %v1426_v40 = vor.u32 %v1690_v34, %v1425_v33  ;;  %v1353_v42 = vld [vmem:[#allocation8 + $0x160] sm:$0xf]  ;;  %v1672_v43 = vld [vmem:[#allocation8 + $0x164] sm:$0xf0]  ;;  %v1201_v48 = vld [vmem:[#allocation8 + $0x30] sm:$0xf]  ;;  %v1274_v51 = vor.u32 %v1652_v41, %v1273_v38 }
  0x28   :  { %615 = vmatpush.bf16.msra.mxu0 %v1226_v24  ;;  %640 = vmatpush.bf16.msra.mxu2 %v1362_v39  ;;  %v1354_v44 = vor.u32 %v1672_v43, %v1353_v42  ;;  %v1417_v45 = vld [vmem:[#allocation8 + $0x1e0] sm:$0xf]  ;;  %v1688_v46 = vld [vmem:[#allocation8 + $0x1e4] sm:$0xf0]  ;;  %v1634_v49 = vld [vmem:[#allocation8 + $0x34] sm:$0xf0] }
  0x29   :  { %628 = vmatpush.bf16.msra.mxu1 %v1290_v25  ;;  %653 = vmatpush.bf16.msra.mxu3 %v1426_v40  ;;  %v1418_v50 = vor.u32 %v1688_v46, %v1417_v45  ;;  %v1345_v52 = vld [vmem:[#allocation8 + $0x150] sm:$0xf]  ;;  %v1670_v53 = vld [vmem:[#allocation8 + $0x154] sm:$0xf0]  ;;  %v1337_v60 = vld [vmem:[#allocation8 + $0x140] sm:$0xf]  ;;  %v1202_v61 = vor.u32 %v1634_v49, %v1201_v48 }
  0x2a   :  { %v1409_v54 = vld [vmem:[#allocation8 + $0x1d0] sm:$0xf]  ;;  %v1650_v56 = vld [vmem:[#allocation8 + $0xb4] sm:$0xf0]  ;;  %v1346_v58 = vor.u32 %v1670_v53, %v1345_v52  ;;  %v1668_v62 = vld [vmem:[#allocation8 + $0x144] sm:$0xf0] }
  0x2b   :  { %v1265_v55 = vld [vmem:[#allocation8 + $0xb0] sm:$0xf]  ;;  %v1686_v57 = vld [vmem:[#allocation8 + $0x1d4] sm:$0xf0]  ;;  %v1401_v63 = vld [vmem:[#allocation8 + $0x1c0] sm:$0xf]  ;;  %v1338_v6 = vor.u32 %v1668_v62, %v1337_v60 }
  0x2c   :  { %616 = vmatpush.bf16.msra.mxu0 %v1218_v31  ;;  %641 = vmatpush.bf16.msra.mxu2 %v1354_v44  ;;  %v1410_v59 = vor.u32 %v1686_v57, %v1409_v54  ;;  %v1684_v0 = vld [vmem:[#allocation8 + $0x1c4] sm:$0xf0]  ;;  %v1266_v1 = vor.u32 %v1650_v56, %v1265_v55  ;;  %v1193_v2 = vld [vmem:[#allocation8 + $0x20] sm:$0xf]  ;;  %v1329_v9 = vld [vmem:[#allocation8 + $0x130] sm:$0xf] }
  0x2d   :  { %629 = vmatpush.bf16.msra.mxu1 %v1282_v35  ;;  %654 = vmatpush.bf16.msra.mxu3 %v1418_v50  ;;  %v1632_v3 = vld [vmem:[#allocation8 + $0x24] sm:$0xf0]  ;;  %v1257_v4 = vld [vmem:[#allocation8 + $0xa0] sm:$0xf]  ;;  %v1402_v7 = vor.u32 %v1684_v0, %v1401_v63  ;;  %v1666_v11 = vld [vmem:[#allocation8 + $0x134] sm:$0xf0] }
  0x2e   :  { %v1648_v5 = vld [vmem:[#allocation8 + $0xa4] sm:$0xf0]  ;;  %v1194_v10 = vor.u32 %v1632_v3, %v1193_v2  ;;  %v1393_v12 = vld [vmem:[#allocation8 + $0x1b0] sm:$0xf]  ;;  %v1682_v13 = vld [vmem:[#allocation8 + $0x1b4] sm:$0xf0]  ;;  %v1330_v19 = vor.u32 %v1666_v11, %v1329_v9 }
  0x2f   :  { %v1258_v14 = vor.u32 %v1648_v5, %v1257_v4  ;;  %v1185_v15 = vld [vmem:[#allocation8 + $0x10] sm:$0xf]  ;;  %v1630_v16 = vld [vmem:[#allocation8 + $0x14] sm:$0xf0]  ;;  %v1394_v20 = vor.u32 %v1682_v13, %v1393_v12  ;;  %v1321_v21 = vld [vmem:[#allocation8 + $0x120] sm:$0xf] }
  0x30   :  { %617 = vmatpush.bf16.msra.mxu0 %v1210_v47  ;;  %642 = vmatpush.bf16.msra.mxu2 %v1346_v58  ;;  %v1249_v17 = vld [vmem:[#allocation8 + $0x90] sm:$0xf]  ;;  %v1646_v18 = vld [vmem:[#allocation8 + $0x94] sm:$0xf0]  ;;  %v1186_v22 = vor.u32 %v1630_v16, %v1185_v15  ;;  %v1664_v23 = vld [vmem:[#allocation8 + $0x124] sm:$0xf0] }
  0x31   :  { %630 = vmatpush.bf16.msra.mxu1 %v1274_v51  ;;  %655 = vmatpush.bf16.msra.mxu3 %v1410_v59  ;;  %v1385_v24 = vld [vmem:[#allocation8 + $0x1a0] sm:$0xf]  ;;  %v1680_v25 = vld [vmem:[#allocation8 + $0x1a4] sm:$0xf0]  ;;  %v1250_v26 = vor.u32 %v1646_v18, %v1249_v17  ;;  %v1641_v30 = vld [vmem:[#allocation8 + $0x74] sm:$0xf]  ;;  %v1322_v34 = vor.u32 %v1664_v23, %v1321_v21 }
  0x32   :  { %v1177_v27 = vld [vmem:[#allocation8] sm:$0xf]  ;;  %v1644_v29 = vld [vmem:[#allocation8 + $0x84] sm:$0xf0]  ;;  %v1235_v31 = vld [vmem:[#allocation8 + $0x78] sm:$0xf0]  ;;  %v1386_v35 = vor.u32 %v1680_v25, %v1385_v24 }
  0x33   :  { %1173 = vmatmul.msk.bf16.vlgmr.msrb.gmra.mxu2 %vm160_vm0, %v2012_v8  ;;  %v1241_v28 = vld [vmem:[#allocation8 + $0x80] sm:$0xf]  ;;  %v1657_v32 = vld [vmem:[#allocation8 + $0xf4] sm:$0xf]  ;;  %v1299_v33 = vld [vmem:[#allocation8 + $0xf8] sm:$0xf0]  ;;  %v1238_v38 = vor.u32 %v1641_v30, %v1235_v31 }
  0x34   :  { %618 = vmatpush.bf16.msra.mxu0 %v1202_v61  ;;  %643 = vmatpush.bf16.msra.mxu2 %v1338_v6  ;;  %v1242_v37 = vor.u32 %v1644_v29, %v1241_v28  ;;  %v1302_v39 = vor.u32 %v1657_v32, %v1299_v33  ;;  %v1639_v40 = vld [vmem:[#allocation8 + $0x64] sm:$0xf]  ;;  %v1227_v41 = vld [vmem:[#allocation8 + $0x68] sm:$0xf0]  ;;  %v1637_v46 = vld [vmem:[#allocation8 + $0x54] sm:$0xf] }
  0x35   :  { %631 = vmatpush.bf16.msra.mxu1 %v1266_v1  ;;  %656 = vmatpush.bf16.msra.mxu3 %v1402_v7  ;;  %v1655_v42 = vld [vmem:[#allocation8 + $0xe4] sm:$0xf]  ;;  %v1291_v43 = vld [vmem:[#allocation8 + $0xe8] sm:$0xf0]  ;;  %v1230_v44 = vor.u32 %v1639_v40, %v1227_v41  ;;  %v1219_v47 = vld [vmem:[#allocation8 + $0x58] sm:$0xf0] }
  0x36   :  { %1174 = vmatmul.msk.bf16.vlgmr.msrb.gmra.mxu3 %vm160_vm0, %v2012_v8  ;;  %v1628_v8 = vld [vmem:[#allocation8 + $0x4] sm:$0xf0]  ;;  %v1294_v45 = vor.u32 %v1655_v42, %v1291_v43  ;;  %v1653_v48 = vld [vmem:[#allocation8 + $0xd4] sm:$0xf]  ;;  %v1222_v49 = vor.u32 %v1637_v46, %v1219_v47  ;;  %v1283_v50 = vld [vmem:[#allocation8 + $0xd8] sm:$0xf0] }
  0x37   :  { %v1178_v36 = vor.u32 %v1628_v8, %v1177_v27  ;;  %v1286_v51 = vor.u32 %v1653_v48, %v1283_v50  ;;  %v1313_v52 = vld [vmem:[#allocation8 + $0x110] sm:$0xf]  ;;  %v1662_v53 = vld [vmem:[#allocation8 + $0x114] sm:$0xf0]  ;;  %v1635_v57 = vld [vmem:[#allocation8 + $0x44] sm:$0xf] }
  0x38   :  { %619 = vmatpush.bf16.msra.mxu0 %v1194_v10  ;;  %644 = vmatpush.bf16.msra.mxu2 %v1330_v19  ;;  %v1377_v54 = vld [vmem:[#allocation8 + $0x190] sm:$0xf]  ;;  %v1314_v55 = vor.u32 %v1662_v53, %v1313_v52  ;;  %v1678_v56 = vld [vmem:[#allocation8 + $0x194] sm:$0xf0]  ;;  %v1211_v58 = vld [vmem:[#allocation8 + $0x48] sm:$0xf0] }
  0x39   :  { %632 = vmatpush.bf16.msra.mxu1 %v1258_v14  ;;  %657 = vmatpush.bf16.msra.mxu3 %v1394_v20  ;;  %v1378_v59 = vor.u32 %v1678_v56, %v1377_v54  ;;  %v1214_v60 = vor.u32 %v1635_v57, %v1211_v58  ;;  %v1651_v61 = vld [vmem:[#allocation8 + $0xc4] sm:$0xf]  ;;  %v1275_v62 = vld [vmem:[#allocation8 + $0xc8] sm:$0xf0]  ;;  %v1305_v0 = vld [vmem:[#allocation8 + $0x100] sm:$0xf] }
  0x3a   :  { %v1278_v63 = vor.u32 %v1651_v61, %v1275_v62  ;;  %v1660_v1 = vld [vmem:[#allocation8 + $0x104] sm:$0xf0]  ;;  %v1369_v2 = vld [vmem:[#allocation8 + $0x180] sm:$0xf]  ;;  %v1633_v5 = vld [vmem:[#allocation8 + $0x34] sm:$0xf] }
  0x3b   :  { %v1306_v3 = vor.u32 %v1660_v1, %v1305_v0  ;;  %v1676_v4 = vld [vmem:[#allocation8 + $0x184] sm:$0xf0]  ;;  %v1203_v6 = vld [vmem:[#allocation8 + $0x38] sm:$0xf0]  ;;  %v1649_v10 = vld [vmem:[#allocation8 + $0xb4] sm:$0xf] }
  0x3c   :  { %620 = vmatpush.bf16.msra.mxu0 %v1186_v22  ;;  %645 = vmatpush.bf16.msra.mxu2 %v1322_v34  ;;  %v1370_v7 = vor.u32 %v1676_v4, %v1369_v2  ;;  %v1206_v9 = vor.u32 %v1633_v5, %v1203_v6  ;;  %v1267_v11 = vld [vmem:[#allocation8 + $0xb8] sm:$0xf0]  ;;  %v1673_v12 = vld [vmem:[#allocation8 + $0x174] sm:$0xf]  ;;  %v1631_v19 = vld [vmem:[#allocation8 + $0x24] sm:$0xf] }
  0x3d   :  { %633 = vmatpush.bf16.msra.mxu1 %v1250_v26  ;;  %658 = vmatpush.bf16.msra.mxu3 %v1386_v35  ;;  %v1270_v13 = vor.u32 %v1649_v10, %v1267_v11  ;;  %v1363_v14 = vld [vmem:[#allocation8 + $0x178] sm:$0xf0]  ;;  %v1689_v15 = vld [vmem:[#allocation8 + $0x1f4] sm:$0xf]  ;;  %v1195_v20 = vld [vmem:[#allocation8 + $0x28] sm:$0xf0] }
  0x3e   :  { %v1427_v16 = vld [vmem:[#allocation8 + $0x1f8] sm:$0xf0]  ;;  %v1366_v17 = vor.u32 %v1673_v12, %v1363_v14  ;;  %v1647_v21 = vld [vmem:[#allocation8 + $0xa4] sm:$0xf]  ;;  %v1198_v22 = vor.u32 %v1631_v19, %v1195_v20  ;;  %v1259_v23 = vld [vmem:[#allocation8 + $0xa8] sm:$0xf0] }
  0x3f   :  { %v1430_v18 = vor.u32 %v1689_v15, %v1427_v16  ;;  %v1671_v24 = vld [vmem:[#allocation8 + $0x164] sm:$0xf]  ;;  %v1355_v25 = vld [vmem:[#allocation8 + $0x168] sm:$0xf0]  ;;  %v1262_v26 = vor.u32 %v1647_v21, %v1259_v23  ;;  %v1629_v30 = vld [vmem:[#allocation8 + $0x14] sm:$0xf] }
  0x40   :  { %621 = vmatpush.bf16.msra.mxu0 %v1178_v36  ;;  %646 = vmatpush.bf16.msra.mxu2 %v1314_v55  ;;  %v1358_v27 = vor.u32 %v1671_v24, %v1355_v25  ;;  %v1687_v8 = vld [vmem:[#allocation8 + $0x1e4] sm:$0xf]  ;;  %v1419_v28 = vld [vmem:[#allocation8 + $0x1e8] sm:$0xf0]  ;;  %v1187_v31 = vld [vmem:[#allocation8 + $0x18] sm:$0xf0] }
  0x41   :  { %634 = vmatpush.bf16.msra.mxu1 %v1242_v37  ;;  %659 = vmatpush.bf16.msra.mxu3 %v1378_v59  ;;  %v1422_v29 = vor.u32 %v1687_v8, %v1419_v28  ;;  %v1645_v32 = vld [vmem:[#allocation8 + $0x94] sm:$0xf]  ;;  %v1190_v33 = vor.u32 %v1629_v30, %v1187_v31  ;;  %v1251_v34 = vld [vmem:[#allocation8 + $0x98] sm:$0xf0]  ;;  %v1627_v42 = vld [vmem:[#allocation8 + $0x4] sm:$0xf] }
  0x42   :  { %v1669_v35 = vld [vmem:[#allocation8 + $0x154] sm:$0xf]  ;;  %v1347_v36 = vld [vmem:[#allocation8 + $0x158] sm:$0xf0]  ;;  %v1254_v37 = vor.u32 %v1645_v32, %v1251_v34  ;;  %v1179_v43 = vld [vmem:[#allocation8 + $0x8] sm:$0xf0] }
  0x43   :  { %v1411_v40 = vld [vmem:[#allocation8 + $0x1d8] sm:$0xf0]  ;;  %v1243_v46 = vld [vmem:[#allocation8 + $0x88] sm:$0xf0]  ;;  %v1667_v47 = vld [vmem:[#allocation8 + $0x144] sm:$0xf] }
  0x44   :  { %666 = vmatpush.bf16.msrb.mxu0 %v1238_v38  ;;  %647 = vmatpush.bf16.msra.mxu2 %v1306_v3  ;;  %v1350_v38 = vor.u32 %v1669_v35, %v1347_v36  ;;  %v1339_v48 = vld [vmem:[#allocation8 + $0x148] sm:$0xf0]  ;;  %v1665_v54 = vld [vmem:[#allocation8 + $0x134] sm:$0xf]  ;;  %v1331_v55 = vld [vmem:[#allocation8 + $0x138] sm:$0xf0] }
  0x45   :  { %679 = vmatpush.bf16.msrb.mxu1 %v1302_v39  ;;  %660 = vmatpush.bf16.msra.mxu3 %v1370_v7  ;;  %v1685_v39 = vld [vmem:[#allocation8 + $0x1d4] sm:$0xf]  ;;  %v1342_v50 = vor.u32 %v1667_v47, %v1339_v48  ;;  %v1403_v52 = vld [vmem:[#allocation8 + $0x1c8] sm:$0xf0]  ;;  %v1334_v57 = vor.u32 %v1665_v54, %v1331_v55  ;;  %v1395_v58 = vld [vmem:[#allocation8 + $0x1b8] sm:$0xf0] }
  0x46   :  { %v1414_v41 = vor.u32 %v1685_v39, %v1411_v40  ;;  %v1681_v56 = vld [vmem:[#allocation8 + $0x1b4] sm:$0xf]  ;;  %v1323_v61 = vld [vmem:[#allocation8 + $0x128] sm:$0xf0]  ;;  %v1679_v62 = vld [vmem:[#allocation8 + $0x1a4] sm:$0xf] }
  0x47   :  { %v1398_v59 = vor.u32 %v1681_v56, %v1395_v58  ;;  %v1387_v0 = vld [vmem:[#allocation8 + $0x1a8] sm:$0xf0]  ;;  %v1661_v3 = vld [vmem:[#allocation8 + $0x114] sm:$0xf]  ;;  %v1315_v4 = vld [vmem:[#allocation8 + $0x118] sm:$0xf0] }
  0x48   :  { %667 = vmatpush.bf16.msrb.mxu0 %v1230_v44  ;;  %692 = vmatpush.bf16.msrb.mxu2 %v1366_v17  ;;  %v1643_v44 = vld [vmem:[#allocation8 + $0x84] sm:$0xf]  ;;  %v1390_v2 = vor.u32 %v1679_v62, %v1387_v0  ;;  %v1677_v5 = vld [vmem:[#allocation8 + $0x194] sm:$0xf]  ;;  %v1379_v6 = vld [vmem:[#allocation8 + $0x198] sm:$0xf0]  ;;  %v1318_v10 = vor.u32 %v1661_v3, %v1315_v4 }
  0x49   :  { %680 = vmatpush.bf16.msrb.mxu1 %v1294_v45  ;;  %705 = vmatpush.bf16.msrb.mxu3 %v1430_v18  ;;  %v1182_v45 = vor.u32 %v1627_v42, %v1179_v43  ;;  %v1382_v11 = vor.u32 %v1677_v5, %v1379_v6  ;;  %v1307_v14 = vld [vmem:[#allocation8 + $0x108] sm:$0xf0]  ;;  %v1675_v17 = vld [vmem:[#allocation8 + $0x184] sm:$0xf]  ;;  %v1489_v39 = vld [vmem:[#allocation10 + $0x70] sm:$0xf] }
  0x4a   :  { %v1371_v18 = vld [vmem:[#allocation8 + $0x188] sm:$0xf0]  ;;  %v1706_v40 = vld [vmem:[#allocation10 + $0x74] sm:$0xf0]  ;;  %v1491_v43 = vld [vmem:[#allocation10 + $0x78] sm:$0xf0] }
  0x4b   :  { %v1374_v23 = vor.u32 %v1675_v17, %v1371_v18  ;;  %v1490_v42 = vor.u32 %v1706_v40, %v1489_v39  ;;  %v1703_v47 = vld [vmem:[#allocation10 + $0x64] sm:$0xf]  ;;  %v1475_v55 = vld [vmem:[#allocation10 + $0x58] sm:$0xf0]  ;;  %v1700_v58 = vld [vmem:[#allocation10 + $0x44] sm:$0xf0] }
  0x4c   :  { %668 = vmatpush.bf16.msrb.mxu0 %v1222_v49  ;;  %693 = vmatpush.bf16.msrb.mxu2 %v1358_v27  ;;  %v1246_v49 = vor.u32 %v1643_v44, %v1243_v46  ;;  %v1704_v46 = vld [vmem:[#allocation10 + $0x64] sm:$0xf0]  ;;  %v1698_v0 = vld [vmem:[#allocation10 + $0x34] sm:$0xf0]  ;;  %v1697_v4 = vld [vmem:[#allocation10 + $0x34] sm:$0xf] }
  0x4d   :  { %681 = vmatpush.bf16.msrb.mxu1 %v1286_v51  ;;  %706 = vmatpush.bf16.msrb.mxu3 %v1422_v29  ;;  %v1683_v51 = vld [vmem:[#allocation8 + $0x1c4] sm:$0xf]  ;;  %v1722_v3 = vld [vmem:[#allocation10 + $0xf4] sm:$0xf0]  ;;  %v1459_v5 = vld [vmem:[#allocation10 + $0x38] sm:$0xf0] }
  0x4e   :  { %v1406_v53 = vor.u32 %v1683_v51, %v1403_v52  ;;  %v1473_v51 = vld [vmem:[#allocation10 + $0x50] sm:$0xf]  ;;  %v1702_v52 = vld [vmem:[#allocation10 + $0x54] sm:$0xf0]  ;;  %v1695_v17 = vld [vmem:[#allocation10 + $0x24] sm:$0xf] }
  0x4f   :  { %v1474_v54 = vor.u32 %v1702_v52, %v1473_v51  ;;  %v1451_v18 = vld [vmem:[#allocation10 + $0x28] sm:$0xf0]  ;;  %v1716_v39 = vld [vmem:[#allocation10 + $0xc4] sm:$0xf0]  ;;  %v1691_v40 = vld [vmem:[#allocation10 + $0x4] sm:$0xf] }
  0x50   :  { %669 = vmatpush.bf16.msrb.mxu0 %v1214_v60  ;;  %694 = vmatpush.bf16.msrb.mxu2 %v1350_v38  ;;  %v1663_v60 = vld [vmem:[#allocation8 + $0x124] sm:$0xf]  ;;  %v1523_v51 = vld [vmem:[#allocation10 + $0xb8] sm:$0xf0]  ;;  %v1513_v52 = vld [vmem:[#allocation10 + $0xa0] sm:$0xf] }
  0x51   :  { %682 = vmatpush.bf16.msrb.mxu1 %v1278_v63  ;;  %707 = vmatpush.bf16.msrb.mxu3 %v1414_v41  ;;  %v130_v63 = vld [vmem:[#allocation7] sm:$0xf]  ;;  %v1326_v1 = vor.u32 %v1663_v60, %v1323_v61  ;;  %v1705_v41 = vld [vmem:[#allocation10 + $0x74] sm:$0xf]  ;;  %v1467_v61 = vld [vmem:[#allocation10 + $0x48] sm:$0xf0] }
  0x52   :  { %v132_v7 = vperm.slane %v130_v63, 0  ;;  %v134_v8 = vperm.slane %v130_v63, 2  ;;  %v135_v28 = vperm.slane %v130_v63, 3  ;;  %v1494_v44 = vor.u32 %v1705_v41, %v1491_v43  ;;  %v1435_v41 = vld [vmem:[#allocation10 + $0x8] sm:$0xf0]  ;;  %s1943_s22 = smov [#allocation13]  }
  0x53   :  { %v1438_v43 = vor.u32 %v1691_v40, %v1435_v41  ;;  %v1728_v41 = vld [vmem:[#allocation11 + $0x28] sm:$0xff]  ;;  %s1140_s1 = sshll.u32 %s1943_s22, 4  ;;  %s1142_s25 = sshll.u32 %s2043_s9, 4  ;;  %s1141_s1 = int_to_ptr.vmem [resolvable:$true] %s1140_s1  ;;  %s1143_s25 = int_to_ptr.hbm [resolvable:$true] %s1142_s25 }
  0x54   :  { %670 = vmatpush.bf16.msrb.mxu0 %v1206_v9  ;;  %695 = vmatpush.bf16.msrb.mxu2 %v1342_v50  ;;  %v133_v9 = vperm.slane %v130_v63, 1  ;;  %v1457_v63 = vld [vmem:[#allocation10 + $0x30] sm:$0xf] }
  0x55   :  { %683 = vmatpush.bf16.msrb.mxu1 %v1270_v13  ;;  %708 = vmatpush.bf16.msrb.mxu3 %v1406_v53  ;;  %v1659_v13 = vld [vmem:[#allocation8 + $0x104] sm:$0xf]  ;;  %v1701_v53 = vld [vmem:[#allocation10 + $0x54] sm:$0xf] }
  0x56   :  { %v1310_v21 = vor.u32 %v1659_v13, %v1307_v14  ;;  %v1478_v56 = vor.u32 %v1701_v53, %v1475_v55  ;;  %v1696_v13 = vld [vmem:[#allocation10 + $0x24] sm:$0xf0]  ;;  %v1545_v14 = vld [vmem:[#allocation10 + $0xe0] sm:$0xf] }
  0x57   :  { %v1712_v53 = vld [vmem:[#allocation10 + $0xa4] sm:$0xf0] }
  0x58   :  { %671 = vmatpush.bf16.msrb.mxu0 %v1198_v22  ;;  %696 = vmatpush.bf16.msrb.mxu2 %v1334_v57  ;;  %v1465_v57 = vld [vmem:[#allocation10 + $0x40] sm:$0xf] }
  0x59   :  { %684 = vmatpush.bf16.msrb.mxu1 %v1262_v26  ;;  %709 = vmatpush.bf16.msrb.mxu3 %v1398_v59  ;;  %v1699_v59 = vld [vmem:[#allocation10 + $0x44] sm:$0xf]  ;;  %v1466_v60 = vor.u32 %v1700_v58, %v1465_v57  ;;  %v1515_v57 = vld [vmem:[#allocation10 + $0xa8] sm:$0xf0] }
  0x5a   :  { %v1470_v62 = vor.u32 %v1699_v59, %v1467_v61  ;;  %v1514_v59 = vor.u32 %v1712_v53, %v1513_v52  ;;  %v1505_v61 = vld [vmem:[#allocation10 + $0x90] sm:$0xf]  ;;  %v1732_v52 = vld [vmem:[#allocation11 + $0x48] sm:$0xff]  ;;  %v1731_v53 = vld [vmem:[#allocation11 + $0x40] sm:$0xff] }
  0x5c   :  { %672 = vmatpush.bf16.msrb.mxu0 %v1190_v33  ;;  %697 = vmatpush.bf16.msrb.mxu2 %v1326_v1  ;;  %v1553_v1 = vld [vmem:[#allocation10 + $0xf0] sm:$0xf] }
  0x5d   :  { %685 = vmatpush.bf16.msrb.mxu1 %v1254_v37  ;;  %710 = vmatpush.bf16.msrb.mxu3 %v1390_v2  ;;  %v1458_v2 = vor.u32 %v1698_v0, %v1457_v63  ;;  %v1554_v6 = vor.u32 %v1722_v3, %v1553_v1  ;;  %v1709_v63 = vld [vmem:[#allocation10 + $0x94] sm:$0xf]  ;;  %v1507_v1 = vld [vmem:[#allocation10 + $0x98] sm:$0xf0] }
  0x5e   :  { %v1510_v3 = vor.u32 %v1709_v63, %v1507_v1 }
  0x60   :  { %673 = vmatpush.bf16.msrb.mxu0 %v1182_v45  ;;  %698 = vmatpush.bf16.msrb.mxu2 %v1318_v10  ;;  %v1481_v45 = vld [vmem:[#allocation10 + $0x60] sm:$0xf]  ;;  %v1555_v10 = vld [vmem:[#allocation10 + $0xf8] sm:$0xf0] }
  0x61   :  { %686 = vmatpush.bf16.msrb.mxu1 %v1246_v49  ;;  %711 = vmatpush.bf16.msrb.mxu3 %v1382_v11  ;;  %v1482_v48 = vor.u32 %v1704_v46, %v1481_v45  ;;  %v1483_v49 = vld [vmem:[#allocation10 + $0x68] sm:$0xf0] }
  0x62   :  { %v1486_v50 = vor.u32 %v1703_v47, %v1483_v49  ;;  %v1531_v45 = vld [vmem:[#allocation10 + $0xc8] sm:$0xf0]  ;;  %v1521_v47 = vld [vmem:[#allocation10 + $0xb0] sm:$0xf]  ;;  %v1713_v49 = vld [vmem:[#allocation10 + $0xb4] sm:$0xf] }
  0x63   :  { %v1526_v55 = vor.u32 %v1713_v49, %v1523_v51  ;;  %v1724_v49 = vld [vmem:[#allocation11 + $0x8] sm:$0xff]  ;;  %v1723_v51 = vld [vmem:[#allocation11] sm:$0xff] }
  0x64   :  { %699 = vmatpush.bf16.msrb.mxu2 %v1310_v21  ;;  %v1719_v21 = vld [vmem:[#allocation10 + $0xe4] sm:$0xf] }
  0x65   :  { %712 = vmatpush.bf16.msrb.mxu3 %v1374_v23 }
  0xa6   :  { %v173_v12 = vpop.f32.mrf.mxu2 }
  0xa7   :  { %v174_v15 = vadd.f32 %v173_v12, %v132_v7  ;;  %v1462_v7 = vor.u32 %v1697_v4, %v1459_v5  ;;  %v1449_v12 = vld [vmem:[#allocation10 + $0x20] sm:$0xf]  ;;  %v288_v4 = vld [vmem:[%s2038_s4] sm:$0x3] }
  0xa9   :  { %v186_v16 = vpop.f32.mrf.mxu3  ;;  %v216_v20 = vmax.f32 %v174_v15, 0.0  ;;  %v1450_v15 = vor.u32 %v1696_v13, %v1449_v12  ;;  %v290_v13 = vperm.slane %v288_v4, 0 }
  0xaa   :  { %v187_v19 = vadd.f32 %v186_v16, %v133_v9  ;;  %v1721_v9 = vld [vmem:[#allocation10 + $0xf4] sm:$0xf]  ;;  %v1720_v16 = vld [vmem:[#allocation10 + $0xe4] sm:$0xf0] }
  0xab   :  { %v220_v24 = vpack.c.bf16 %v216_v20, %v216_v20  ;;  %v1558_v11 = vor.u32 %v1721_v9, %v1555_v10  ;;  %v1454_v20 = vor.u32 %v1695_v17, %v1451_v18  ;;  %v1707_v9 = vld [vmem:[#allocation10 + $0x84] sm:$0xf] }
  0xac   :  { %v217_v22 = vmax.f32 %v187_v19, 0.0  ;;  %v1546_v19 = vor.u32 %v1720_v16, %v1545_v14  ;;  %v1730_v14 = vld [vmem:[#allocation11 + $0x38] sm:$0xff] }
  0xad   :  { %622 = vmatmul.bf16.vlgmr.msra.gmra.mxu0 %v220_v24 }
  0xae   :  { %v221_v25 = vpack.c.bf16 %v217_v22, %v217_v22  ;;  %v175_v26 = vpop.f32.mrf.mxu2  ;;  %920 = vmatpush.bf16.msra.mxu0 %v1490_v42  ;;  %v1547_v22 = vld [vmem:[#allocation10 + $0xe8] sm:$0xf0] }
  0xaf   :  { %v1550_v23 = vor.u32 %v1719_v21, %v1547_v22  ;;  %v1537_v26 = vld [vmem:[#allocation10 + $0xd0] sm:$0xf] }
  0xb0   :  { %635 = vmatmul.bf16.vlgmr.msra.gmra.mxu1 %v221_v25 }
  0xb1   :  { %v188_v27 = vpop.f32.mrf.mxu3  ;;  %933 = vmatpush.bf16.msra.mxu1 %v1554_v6  ;;  %v1497_v6 = vld [vmem:[#allocation10 + $0x80] sm:$0xf] }
  0xb2   :  { %921 = vmatpush.bf16.msra.mxu0 %v1482_v48  ;;  %v1714_v48 = vld [vmem:[#allocation10 + $0xb4] sm:$0xf0] }
  0xb5   :  { %934 = vmatpush.bf16.msra.mxu1 %v1546_v19  ;;  %v1729_v19 = vld [vmem:[#allocation11 + $0x30] sm:$0xff] }
  0xb6   :  { %v199_v29 = vpop.f32.mrf.mxu2  ;;  %922 = vmatpush.bf16.msra.mxu0 %v1474_v54 }
  0xb7   :  { %v200_v30 = vadd.f32 %v199_v29, %v134_v8  ;;  %v1718_v8 = vld [vmem:[#allocation10 + $0xd4] sm:$0xf0]  ;;  %v1443_v29 = vld [vmem:[#allocation10 + $0x18] sm:$0xf0] }
  0xb9   :  { %v212_v31 = vpop.f32.mrf.mxu3  ;;  %v218_v33 = vmax.f32 %v200_v30, 0.0  ;;  %v1538_v30 = vor.u32 %v1718_v8, %v1537_v26  ;;  %v291_v8 = vperm.slane %v288_v4, 1 }
  0xba   :  { %v213_v32 = vadd.f32 %v212_v31, %v135_v28  ;;  %923 = vmatpush.bf16.msra.mxu0 %v1466_v60  ;;  %v1693_v28 = vld [vmem:[#allocation10 + $0x14] sm:$0xf] }
  0xbb   :  { %v222_v35 = vpack.c.bf16 %v218_v33, %v218_v33  ;;  %v1446_v31 = vor.u32 %v1693_v28, %v1443_v29  ;;  %v1539_v33 = vld [vmem:[#allocation10 + $0xd8] sm:$0xf0]  ;;  %935 = vmatpush.bf16.msra.mxu1 %v1538_v30 }
  0xbc   :  { %v219_v34 = vmax.f32 %v213_v32, 0.0  ;;  %v1717_v32 = vld [vmem:[#allocation10 + $0xd4] sm:$0xf] }
  0xbd   :  { %648 = vmatmul.bf16.vlgmr.msra.gmra.mxu2 %v222_v35  ;;  %674 = vmatmul.bf16.vlgmr.msrb.gmra.mxu0 %v220_v24  ;;  %v1441_v24 = vld [vmem:[#allocation10 + $0x10] sm:$0xf] }
  0xbe   :  { %v223_v36 = vpack.c.bf16 %v219_v34, %v219_v34  ;;  %v201_v37 = vpop.f32.mrf.mxu2  ;;  %946 = vmatpush.bf16.msra.mxu2 %v1494_v44  ;;  %924 = vmatpush.bf16.msra.mxu0 %v1458_v2  ;;  %v1542_v34 = vor.u32 %v1717_v32, %v1539_v33  ;;  %v1715_v44 = vld [vmem:[#allocation10 + $0xc4] sm:$0xf] }
  0xbf   :  { %v1529_v37 = vld [vmem:[#allocation10 + $0xc0] sm:$0xf]  ;;  %v1534_v46 = vor.u32 %v1715_v44, %v1531_v45  ;;  %v1736_v44 = vld [vmem:[#allocation11 + $0x68] sm:$0xff]  ;;  %v1726_v45 = vld [vmem:[#allocation11 + $0x18] sm:$0xff] }
  0xc0   :  { %661 = vmatmul.bf16.vlgmr.msra.gmra.mxu3 %v223_v36  ;;  %687 = vmatmul.bf16.vlgmr.msrb.gmra.mxu1 %v221_v25  ;;  %v1694_v25 = vld [vmem:[#allocation10 + $0x14] sm:$0xf0]  ;;  %v1530_v42 = vor.u32 %v1716_v39, %v1529_v37 }
  0xc1   :  { %v214_v38 = vpop.f32.mrf.mxu3  ;;  %959 = vmatpush.bf16.msra.mxu3 %v1558_v11  ;;  %v1442_v27 = vor.u32 %v1694_v25, %v1441_v24  ;;  %v1499_v11 = vld [vmem:[#allocation10 + $0x88] sm:$0xf0] }
  0xc2   :  { %947 = vmatpush.bf16.msra.mxu2 %v1486_v50  ;;  %925 = vmatpush.bf16.msra.mxu0 %v1450_v15  ;;  %v1522_v50 = vor.u32 %v1714_v48, %v1521_v47  ;;  %v1502_v12 = vor.u32 %v1707_v9, %v1499_v11  ;;  %v1738_v15 = vld [vmem:[#allocation11 + $0x78] sm:$0xff]  ;;  %v1725_v47 = vld [vmem:[#allocation11 + $0x10] sm:$0xff] }
  0xc3   :  { %936 = vmatpush.bf16.msra.mxu1 %v1530_v42  ;;  %v1737_v42 = vld [vmem:[#allocation11 + $0x70] sm:$0xff]  ;;  %v1734_v48 = vld [vmem:[#allocation11 + $0x58] sm:$0xff] }
  0xc4   :  { %v1752_v11 = vld [vmem:[%s2042_s8] ss:$0 sm:$0xff] }
  0xc5   :  { %960 = vmatpush.bf16.msra.mxu3 %v1550_v23 }
  0xc6   :  { %948 = vmatpush.bf16.msra.mxu2 %v1478_v56  ;;  %926 = vmatpush.bf16.msra.mxu0 %v1442_v27  ;;  %v1711_v56 = vld [vmem:[#allocation10 + $0xa4] sm:$0xf] }
  0xc7   :  { %937 = vmatpush.bf16.msra.mxu1 %v1522_v50  ;;  %v1518_v60 = vor.u32 %v1711_v56, %v1515_v57  ;;  %v1733_v50 = vld [vmem:[#allocation11 + $0x50] sm:$0xff] }
  0xc8   :  { %v754_v56 = vld [vmem:[%s2040_s6] sm:$0x3] }
  0xc9   :  { %961 = vmatpush.bf16.msra.mxu3 %v1542_v34 }
  0xca   :  { %949 = vmatpush.bf16.msra.mxu2 %v1470_v62  ;;  %v1710_v62 = vld [vmem:[#allocation10 + $0x94] sm:$0xf0] }
  0xcb   :  { %938 = vmatpush.bf16.msra.mxu1 %v1514_v59  ;;  %v1506_v0 = vor.u32 %v1710_v62, %v1505_v61  ;;  %v757_v62 = vperm.slane %v754_v56, 1 }
  0xcd   :  { %700 = vmatmul.bf16.vlgmr.msrb.gmra.mxu2 %v222_v35  ;;  %v1433_v35 = vld [vmem:[#allocation10] sm:$0xf]  ;;  %962 = vmatpush.bf16.msra.mxu3 %v1534_v46 }
  0xce   :  { %950 = vmatpush.bf16.msra.mxu2 %v1462_v7  ;;  %v1708_v7 = vld [vmem:[#allocation10 + $0x84] sm:$0xf0]  ;;  %v1735_v46 = vld [vmem:[#allocation11 + $0x60] sm:$0xff] }
  0xcf   :  { %939 = vmatpush.bf16.msra.mxu1 %v1506_v0  ;;  %v1498_v10 = vor.u32 %v1708_v7, %v1497_v6 }
  0xd0   :  { %713 = vmatmul.bf16.vlgmr.msrb.gmra.mxu3 %v223_v36  ;;  %v1692_v36 = vld [vmem:[#allocation10 + $0x4] sm:$0xf0] }
  0xd1   :  { %v1434_v38 = vor.u32 %v1692_v36, %v1433_v35  ;;  %963 = vmatpush.bf16.msra.mxu3 %v1526_v55 }
  0xd2   :  { %951 = vmatpush.bf16.msra.mxu2 %v1454_v20 }
  0xd3   :  { %927 = vmatpush.bf16.msra.mxu0 %v1434_v38  ;;  %940 = vmatpush.bf16.msra.mxu1 %v1498_v10 }
  0xd5   :  { %964 = vmatpush.bf16.msra.mxu3 %v1518_v60 }
  0xd6   :  { %952 = vmatpush.bf16.msra.mxu2 %v1446_v31 }
  0xd7   :  { %1108 = vmatpush.bf16.msrb.mxu0 %v1730_v14  ;;  %1121 = vmatpush.bf16.msrb.mxu1 %v1738_v15 }
  0xd9   :  { %965 = vmatpush.bf16.msra.mxu3 %v1510_v3 }
  0xda   :  { %953 = vmatpush.bf16.msra.mxu2 %v1438_v43  ;;  %v1727_v43 = vld [vmem:[#allocation11 + $0x20] sm:$0xff] }
  0xdb   :  { %1109 = vmatpush.bf16.msrb.mxu0 %v1729_v19  ;;  %1122 = vmatpush.bf16.msrb.mxu1 %v1737_v42 }
  0xdd   :  { %966 = vmatpush.bf16.msra.mxu3 %v1502_v12 }
  0xdf   :  { %1110 = vmatpush.bf16.msrb.mxu0 %v1728_v41  ;;  %1123 = vmatpush.bf16.msrb.mxu1 %v1736_v44 }
  0xe3   :  { %1111 = vmatpush.bf16.msrb.mxu0 %v1727_v43  ;;  %1124 = vmatpush.bf16.msrb.mxu1 %v1735_v46 }
  0xe7   :  { %1112 = vmatpush.bf16.msrb.mxu0 %v1726_v45  ;;  %1125 = vmatpush.bf16.msrb.mxu1 %v1734_v48 }
  0xeb   :  { %1113 = vmatpush.bf16.msrb.mxu0 %v1725_v47  ;;  %1126 = vmatpush.bf16.msrb.mxu1 %v1733_v50 }
  0xef   :  { %1114 = vmatpush.bf16.msrb.mxu0 %v1724_v49  ;;  %1127 = vmatpush.bf16.msrb.mxu1 %v1732_v52 }
  0xf3   :  { %1115 = vmatpush.bf16.msrb.mxu0 %v1723_v51  ;;  %1128 = vmatpush.bf16.msrb.mxu1 %v1731_v53 }
 0x12a   :  { %v623_v54 = vpop.f32.mrf.mxu0 }
 0x12b   :  { %v624_v17 = vadd.f32 %v623_v54, %v290_v13 }
 0x12d   :  { %v636_v58 = vpop.f32.mrf.mxu1 }
 0x12e   :  { %v637_v20 = vadd.f32 %v636_v58, %v624_v17  ;;  %v756_v58 = vperm.slane %v754_v56, 0 }
 0x132   :  { %v625_v2 = vpop.f32.mrf.mxu0 }
 0x135   :  { %v638_v5 = vpop.f32.mrf.mxu1 }
 0x13a   :  { %v675_v16 = vpop.f32.mrf.mxu0 }
 0x13b   :  { %v676_v31 = vadd.f32 %v675_v16, %v291_v8 }
 0x13d   :  { %v688_v18 = vpop.f32.mrf.mxu1 }
 0x13e   :  { %v689_v32 = vadd.f32 %v688_v18, %v676_v31 }
 0x140   :  { %v649_v21 = vpop.f32.mrf.mxu2 }
 0x141   :  { %v650_v22 = vadd.f32 %v649_v21, %v637_v20 }
 0x142   :  { %v677_v24 = vpop.f32.mrf.mxu0 }
 0x143   :  { %v662_v23 = vpop.f32.mrf.mxu3 }
 0x144   :  { %v663_v25 = vadd.f32 %v662_v23, %v650_v22 }
 0x145   :  { %v690_v26 = vpop.f32.mrf.mxu1 }
 0x146   :  { %v718_v27 = vmax.f32 %v663_v25, 0.0 }
 0x148   :  { %v720_v28 = vpack.c.bf16 %v718_v27, %v718_v27  ;;  %v651_v29 = vpop.f32.mrf.mxu2 }
 0x14a   :  { %928 = vmatmul.bf16.vlgmr.msra.gmra.mxu0 %v720_v28  ;;  %954 = vmatmul.bf16.vlgmr.msra.gmra.mxu2 %v720_v28 }
 0x14b   :  { %v664_v30 = vpop.f32.mrf.mxu3 }
 0x150   :  { %v701_v33 = vpop.f32.mrf.mxu2 }
 0x151   :  { %v702_v34 = vadd.f32 %v701_v33, %v689_v32 }
 0x153   :  { %v714_v35 = vpop.f32.mrf.mxu3 }
 0x154   :  { %v715_v36 = vadd.f32 %v714_v35, %v702_v34 }
 0x156   :  { %v719_v37 = vmax.f32 %v715_v36, 0.0 }
 0x158   :  { %v721_v38 = vpack.c.bf16 %v719_v37, %v719_v37  ;;  %v703_v39 = vpop.f32.mrf.mxu2 }
 0x15a   :  { %941 = vmatmul.bf16.vlgmr.msra.gmra.mxu1 %v721_v38  ;;  %967 = vmatmul.bf16.vlgmr.msra.gmra.mxu3 %v721_v38 }
 0x15b   :  { %v716_v40 = vpop.f32.mrf.mxu3 }
 0x1c7   :  { %v929_v54 = vpop.f32.mrf.mxu0 }
 0x1c8   :  { %v930_v60 = vadd.f32 %v929_v54, %v756_v58 }
 0x1cd   :  { %v955_v55 = vpop.f32.mrf.mxu2 }
 0x1ce   :  { %v956_v1 = vadd.f32 %v955_v55, %v757_v62 }
 0x1cf   :  { %v931_v57 = vpop.f32.mrf.mxu0 }
 0x1d5   :  { %v957_v59 = vpop.f32.mrf.mxu2 }
 0x1d7   :  { %v942_v61 = vpop.f32.mrf.mxu1 }
 0x1d8   :  { %v943_v63 = vadd.f32 %v942_v61, %v930_v60 }
 0x1da   :  { %v972_v0 = vmax.f32 %v943_v63, 0.0 }
 0x1dc   :  { %v974_v2 = vpack.c.bf16 %v972_v0, %v972_v0 }
 0x1dd   :  { %v968_v3 = vpop.f32.mrf.mxu3 }
 0x1de   :  { %v969_v4 = vadd.f32 %v968_v3, %v956_v1  ;;  %1116 = vmatmul.bf16.vlgmr.msrb.gmra.mxu0 %v974_v2 }
 0x1df   :  { %v944_v5 = vpop.f32.mrf.mxu1 }
 0x1e0   :  { %v973_v6 = vmax.f32 %v969_v4, 0.0 }
 0x1e2   :  { %v975_v7 = vpack.c.bf16 %v973_v6, %v973_v6 }
 0x1e4   :  { %1129 = vmatmul.bf16.vlgmr.msrb.gmra.mxu1 %v975_v7 }
 0x1e5   :  { %v970_v9 = vpop.f32.mrf.mxu3 }
 0x25b   :  { %v1117_v10 = vpop.f32.mrf.mxu0 }
 0x25c   :  { %v1118_v12 = vadd.f32 %v1752_v11, %v1117_v10 }
 0x261   :  { %v1130_v13 = vpop.f32.mrf.mxu1 }
 0x262   :  { %v1131_v14 = vadd.f32 %v1130_v13, %v1118_v12 }
 0x263   :  { %v1119_v15 = vpop.f32.mrf.mxu0 }
 0x264   :  { %1134 = vst [vmem:[#allocation13] sm:$0xff] %v1131_v14 }
 0x265   :  { %1145 = dma.vmem_to_hbm [thread:$0]  %s1141_s1, 128, %s1143_s25, [#allocation4]  }
 0x269   :  { %v1132_v16 = vpop.f32.mrf.mxu1 }
 0x26a   :  { %1929 = dma.done.wait [#allocation4], 128  }
 0x26b   :  { %1930 = vsyncadd [#allocation4], 4294967168 }
 0x26c   :  { %1150 = vsyncpa [#allocation3], 1 }
 0x26d   :  { %1151 = vsyncpa [#allocation6], 1 }
 0x26e   :  { %1152 = vsyncpa [#allocation9], 1 }
 0x26f   :  { %1153 = vsyncpa [#allocation12], 1 }
 0x270   :  { %1154 = vsyncpa [#allocation4], 1 }

</bundles_post_ra>
